<compile_context>
chip_gen: v6e
topology: v6e:2x2x1
jax: 0.10.0
libtpu: 0.0.40
codegen_flags: <defaults>
</compile_context>

<pallas_src>
import jax
import jax.numpy as jnp
from jax import lax
from jax.experimental import pallas as pl
from jax.experimental.pallas import tpu as pltpu

HIDDEN1 = 256
HIDDEN2 = 128
NEG_SLOPE = 0.01   # nn.LeakyReLU default negative_slope
BN_EPS = 1e-5

# Matmul operand dtype: f32 preserves the PyTorch module's numerics (1e-4
# check below). Set to jnp.bfloat16 for ~3-4x MXU throughput if ~1e-2
# accuracy is acceptable; accumulation is always f32.
MATMUL_DTYPE = jnp.float32


def mlp_kernel(x_ref, w1_ref, b1_ref, w2_ref, b2_ref, w3_ref, b3_ref, o_ref):
    # Linear(input_dim -> 256) with eval-mode BatchNorm1d folded into W1'/b1'.
    # Mosaic computes f32 x f32 dots exactly on the MXU (multi-pass), so no
    # precision override is needed for the 1e-4 tolerance.
    h1 = jnp.dot(x_ref[...], w1_ref[...],
                 preferred_element_type=jnp.float32) + b1_ref[...]
    # LeakyReLU as mul+max: 2 VPU ops/elem vs 3 for compare+select.
    h1 = jnp.maximum(h1, NEG_SLOPE * h1)
    # Linear(256 -> 128) + bias.  Dropout(p=0.09) is identity in eval mode.
    h2 = jnp.dot(h1.astype(w2_ref.dtype), w2_ref[...],
                 preferred_element_type=jnp.float32) + b2_ref[...]
    h2 = jnp.maximum(h2, NEG_SLOPE * h2)
    # Linear(128 -> 1) as (1,128) x (tile_b,128)^T on the MXU: yields the
    # lane-dense (1, tile_b) row directly (no sublane->lane XLU relayout).
    out = lax.dot_general(w3_ref[...], h2.astype(w3_ref.dtype),
                          (((1,), (1,)), ((), ())),
                          preferred_element_type=jnp.float32)
    # b3 is an SMEM scalar: free on the scalar path, no padded VMEM operand.
    o_ref[...] = (out + b3_ref[0, 0]).astype(o_ref.dtype)


def _choose_tile_b(batch, d, x_itemsize):
    """Derive the batch tile from a VMEM budget (not a fixed cap)."""
    # Row-dependent VMEM bytes/row: double-buffered input tile + f32 h1/h2
    # temporaries + 8-sublane-padded (1, tile_b) output blocks (x2 buffers).
    per_row = 2 * d * x_itemsize + 4 * (HIDDEN1 + HIDDEN2) + 2 * 8 * 4
    row_budget = 12 * 1024 * 1024   # stays well under v7x's scoped VMEM
    cap = (row_budget // per_row) // 128 * 128
    cap = max(128, min(4096, cap))
    if batch > cap:
        return cap
    if batch > 256:
        # Force >= 2 tiles so the "parallel" batch axis shards across both
        # TensorCores on v7x instead of serializing on one core.
        half = -(-batch // 2)
        return min(cap, ((half + 127) // 128) * 128)
    return max(128, ((batch + 127) // 128) * 128)


def prepare_params(raw_params):
    """Fold eval-mode BatchNorm into the first Linear and pre-shape w3/b3.

    Call this ONCE per weight set (outside the inference path) so the D*256
    elementwise pass over W1 is not repeated on every call.
    """
    w1, b1, bn_scale, bn_shift, w2, b2, w3, b3 = raw_params
    w1f = (w1 * bn_scale).astype(MATMUL_DTYPE)                # (D, 256)
    b1f = (b1 * bn_scale + bn_shift).astype(jnp.float32)      # (1, 256)
    w2c = w2.astype(MATMUL_DTYPE)                             # (256, 128)
    b2c = b2.astype(jnp.float32)                              # (1, 128)
    w3_row = w3.reshape(1, HIDDEN2).astype(MATMUL_DTYPE)      # (1, 128)
    b3c = b3.reshape(1, 1).astype(jnp.float32)                # (1, 1) -> SMEM
    return (w1f, b1f, w2c, b2c, w3_row, b3c)


@jax.jit
def prediction_model_forward(edge_emb, prepared_params):
    """edge_emb: (B, input_dim) f32.  Returns (B, 1) f32."""
    B, D = edge_emb.shape
    w1f, b1f, w2, b2, w3_row, b3 = prepared_params

    x = edge_emb.astype(MATMUL_DTYPE)
    x_itemsize = jnp.dtype(MATMUL_DTYPE).itemsize

    tile_b = _choose_tile_b(B, D, x_itemsize)
    num_tiles = -(-B // tile_b)               # ceil div
    padded_b = num_tiles * tile_b
    if padded_b != B:
        x = jnp.pad(x, ((0, padded_b - B), (0, 0)))

    # VMEM footprint -> derived scoped-VMEM limit (capped for v7x safety).
    weight_bytes = (x_itemsize * (D * HIDDEN1 + HIDDEN1 * HIDDEN2 + HIDDEN2)
                    + 4 * (HIDDEN1 + HIDDEN2))
    vmem_bytes = (2 * tile_b * D * x_itemsize          # double-buffered input
                  + 2 * weight_bytes                   # resident weights (x2 bufs)
                  + tile_b * (HIDDEN1 + HIDDEN2) * 4   # h1/h2 f32 temporaries
                  + 2 * 8 * tile_b * 4)                # padded output row blocks
    vmem_limit = int(min(32 * 1024 * 1024,
                         max(16 * 1024 * 1024, 2 * vmem_bytes)))

    flops = 2 * padded_b * (D * HIDDEN1 + HIDDEN1 * HIDDEN2 + HIDDEN2)
    bytes_accessed = (padded_b * D * x_itemsize        # input stream
                      + weight_bytes + 4               # weights, biases, b3
                      + 4 * padded_b)                  # output row

    out = pl.pallas_call(
        mlp_kernel,
        out_shape=jax.ShapeDtypeStruct((1, padded_b), jnp.float32),
        grid_spec=pltpu.PrefetchScalarGridSpec(
            num_scalar_prefetch=0,
            grid=(num_tiles,),
            in_specs=[
                pl.BlockSpec((tile_b, D), lambda i: (i, 0)),         # edge_emb tile
                pl.BlockSpec((D, HIDDEN1), lambda i: (0, 0)),        # W1' (resident)
                pl.BlockSpec((1, HIDDEN1), lambda i: (0, 0)),        # b1'
                pl.BlockSpec((HIDDEN1, HIDDEN2), lambda i: (0, 0)),  # W2
                pl.BlockSpec((1, HIDDEN2), lambda i: (0, 0)),        # b2
                pl.BlockSpec((1, HIDDEN2), lambda i: (0, 0)),        # w3 row
                pl.BlockSpec(memory_space=pltpu.MemorySpace.SMEM),   # b3 scalar
            ],
            out_specs=pl.BlockSpec((1, tile_b), lambda i: (0, i)),   # lane-dense row
        ),
        compiler_params=pltpu.CompilerParams(
            dimension_semantics=("parallel",),
            vmem_limit_bytes=vmem_limit,
        ),
        cost_estimate=pl.CostEstimate(
            flops=flops, transcendentals=0, bytes_accessed=bytes_accessed),
    )(x, w1f, b1f, w2, b2, w3_row, b3)

    return out.reshape(padded_b, 1)[:B]


def init_params(key, input_dim):
    """Deterministic synthetic parameters matching the module's shapes."""
    ks = jax.random.split(key, 10)

    def uniform(k, shape, fan_in):
        bound = 1.0 / jnp.sqrt(fan_in)
        return jax.random.uniform(k, shape, jnp.float32, -bound, bound)

    # Linear(input_dim, 256)
    w1 = uniform(ks[0], (input_dim, HIDDEN1), input_dim)
    b1 = uniform(ks[1], (1, HIDDEN1), input_dim)
    # BatchNorm1d(256) eval-mode parameters / running stats
    gamma = 1.0 + 0.1 * jax.random.normal(ks[2], (1, HIDDEN1), jnp.float32)
    beta = 0.1 * jax.random.normal(ks[3], (1, HIDDEN1), jnp.float32)
    running_mean = 0.1 * jax.random.normal(ks[4], (1, HIDDEN1), jnp.float32)
    running_var = 1.0 + 0.1 * jax.random.uniform(ks[5], (1, HIDDEN1), jnp.float32)
    inv_std = 1.0 / jnp.sqrt(running_var + BN_EPS)
    bn_scale = gamma * inv_std
    bn_shift = beta - gamma * running_mean * inv_std
    # Linear(256, 128)
    w2 = uniform(ks[6], (HIDDEN1, HIDDEN2), HIDDEN1)
    b2 = uniform(ks[7], (1, HIDDEN2), HIDDEN1)
    # Linear(128, 1)
    w3 = uniform(ks[8], (HIDDEN2, 1), HIDDEN2)
    b3 = uniform(ks[9], (1, 1), HIDDEN2)
    return (w1, b1, bn_scale, bn_shift, w2, b2, w3, b3)


def reference_forward(edge_emb, raw_params):
    """Pure-JAX eval-mode reference, pinned to full-f32 matmul precision."""
    w1, b1, bn_scale, bn_shift, w2, b2, w3, b3 = raw_params
    hp = jax.lax.Precision.HIGHEST
    h1 = jnp.dot(edge_emb, w1, precision=hp) + b1
    h1 = h1 * bn_scale + bn_shift
    h1 = jnp.where(h1 > 0, h1, NEG_SLOPE * h1)
    h2 = jnp.dot(h1, w2, precision=hp) + b2
    h2 = jnp.where(h2 > 0, h2, NEG_SLOPE * h2)
    return jnp.dot(h2, w3, precision=hp) + b3


if __name__ == "__main__":
    B = 8
    INPUT_DIM = 32

    key = jax.random.PRNGKey(0)
    k_x, k_p = jax.random.split(key)
    edge_emb = jax.random.normal(k_x, (B, INPUT_DIM), jnp.float32)
    raw_params = init_params(k_p, INPUT_DIM)

    # BN folding hoisted out of the per-call path (done once per weight set).
    params = prepare_params(raw_params)

    out = prediction_model_forward(edge_emb, params)
    out = jax.block_until_ready(out)

    ref = reference_forward(edge_emb, raw_params)
    assert out.shape == (B, 1)
    tol = 1e-4 if jnp.dtype(MATMUL_DTYPE) == jnp.dtype(jnp.float32) else 2e-2
    assert jnp.allclose(out, ref, atol=tol, rtol=tol), "mismatch vs JAX reference"

    print("KERNEL_OK")
</pallas_src>

<mosaic_0001>
module attributes {stable_mosaic.version = 11 : i64} {
  func.func @mlp_kernel(%arg0: i32, %arg1: memref<128x32xf32, #tpu.memory_space<vmem>>, %arg2: memref<32x256xf32, #tpu.memory_space<vmem>>, %arg3: memref<1x256xf32, #tpu.memory_space<vmem>>, %arg4: memref<256x128xf32, #tpu.memory_space<vmem>>, %arg5: memref<1x128xf32, #tpu.memory_space<vmem>>, %arg6: memref<1x128xf32, #tpu.memory_space<vmem>>, %arg7: memref<1x1xf32, #tpu.memory_space<smem>>, %arg8: memref<1x128xf32, #tpu.memory_space<vmem>>) attributes {dimension_semantics = [#tpu.dimension_semantics<parallel>], iteration_bounds = array<i64: 1>, scalar_prefetch = 0 : i64, scratch_operands = 0 : i64, tpu.core_type = #tpu.core_type<tc>, window_params = [{transform_indices = @transform_0, window_bounds = array<i64: 128, 32>}, {pipeline_mode = #tpu.pipeline_mode<synchronous>, transform_indices = @transform_1, window_bounds = array<i64: 32, 256>}, {pipeline_mode = #tpu.pipeline_mode<synchronous>, transform_indices = @transform_2, window_bounds = array<i64: 1, 256>}, {pipeline_mode = #tpu.pipeline_mode<synchronous>, transform_indices = @transform_3, window_bounds = array<i64: 256, 128>}, {pipeline_mode = #tpu.pipeline_mode<synchronous>, transform_indices = @transform_4, window_bounds = array<i64: 1, 128>}, {pipeline_mode = #tpu.pipeline_mode<synchronous>, transform_indices = @transform_5, window_bounds = array<i64: 1, 128>}, {transform_indices = @transform_6, window_bounds = array<i64: 1, 1>}, {transform_indices = @transform_7, window_bounds = array<i64: 1, 128>}]} {
    %c0 = arith.constant 0 : index
    %c0_0 = arith.constant 0 : index
    %0 = vector.load %arg1[%c0, %c0_0] : memref<128x32xf32, #tpu.memory_space<vmem>>, vector<128x32xf32>
    %c0_1 = arith.constant 0 : index
    %c0_2 = arith.constant 0 : index
    %1 = vector.load %arg2[%c0_1, %c0_2] : memref<32x256xf32, #tpu.memory_space<vmem>>, vector<32x256xf32>
    %cst = arith.constant dense<0.000000e+00> : vector<128x256xf32>
    %2 = tpu.matmul %0, %1, %cst {dimension_numbers = #tpu.dot_dimension_numbers<[1], [0], [0], [1], [0, 0, 1, 1], [], []>} : vector<128x32xf32>, vector<32x256xf32>, vector<128x256xf32> -> vector<128x256xf32>
    %c0_3 = arith.constant 0 : index
    %c0_4 = arith.constant 0 : index
    %3 = vector.load %arg3[%c0_3, %c0_4] : memref<1x256xf32, #tpu.memory_space<vmem>>, vector<1x256xf32>
    %4 = vector.broadcast %3 : vector<1x256xf32> to vector<128x256xf32>
    %5 = arith.addf %2, %4 : vector<128x256xf32>
    %cst_5 = arith.constant 0.00999999977 : f32
    %6 = vector.broadcast %cst_5 : f32 to vector<128x256xf32>
    %7 = arith.mulf %6, %5 : vector<128x256xf32>
    %8 = arith.maximumf %5, %7 : vector<128x256xf32>
    %c0_6 = arith.constant 0 : index
    %c0_7 = arith.constant 0 : index
    %9 = vector.load %arg4[%c0_6, %c0_7] : memref<256x128xf32, #tpu.memory_space<vmem>>, vector<256x128xf32>
    %cst_8 = arith.constant dense<0.000000e+00> : vector<128x128xf32>
    %10 = tpu.matmul %8, %9, %cst_8 {dimension_numbers = #tpu.dot_dimension_numbers<[1], [0], [0], [1], [0, 0, 1, 1], [], []>} : vector<128x256xf32>, vector<256x128xf32>, vector<128x128xf32> -> vector<128x128xf32>
    %c0_9 = arith.constant 0 : index
    %c0_10 = arith.constant 0 : index
    %11 = vector.load %arg5[%c0_9, %c0_10] : memref<1x128xf32, #tpu.memory_space<vmem>>, vector<1x128xf32>
    %12 = vector.broadcast %11 : vector<1x128xf32> to vector<128x128xf32>
    %13 = arith.addf %10, %12 : vector<128x128xf32>
    %cst_11 = arith.constant 0.00999999977 : f32
    %14 = vector.broadcast %cst_11 : f32 to vector<128x128xf32>
    %15 = arith.mulf %14, %13 : vector<128x128xf32>
    %16 = arith.maximumf %13, %15 : vector<128x128xf32>
    %c0_12 = arith.constant 0 : index
    %c0_13 = arith.constant 0 : index
    %17 = vector.load %arg6[%c0_12, %c0_13] : memref<1x128xf32, #tpu.memory_space<vmem>>, vector<1x128xf32>
    %cst_14 = arith.constant dense<0.000000e+00> : vector<1x128xf32>
    %18 = tpu.matmul %17, %16, %cst_14 {dimension_numbers = #tpu.dot_dimension_numbers<[1], [1], [0], [0], [0, 0, 1, 0], [], []>} : vector<1x128xf32>, vector<128x128xf32>, vector<1x128xf32> -> vector<1x128xf32>
    %c0_15 = arith.constant 0 : index
    %c0_16 = arith.constant 0 : index
    %19 = memref.load %arg7[%c0_15, %c0_16] : memref<1x1xf32, #tpu.memory_space<smem>>
    %20 = vector.broadcast %19 : f32 to vector<1x128xf32>
    %21 = arith.addf %18, %20 : vector<1x128xf32>
    %c0_17 = arith.constant 0 : index
    %c0_18 = arith.constant 0 : index
    %22 = vector.load %arg8[%c0_17, %c0_18] : memref<1x128xf32, #tpu.memory_space<vmem>>, vector<1x128xf32>
    tpu.vector_store %arg8[%c0_17, %c0_18], %21 {strides = array<i32>} : memref<1x128xf32, #tpu.memory_space<vmem>>, vector<1x128xf32>,
    return
  }
  func.func @transform_0(%arg0: i32) -> (i32, i32) {
    %c0_i32 = arith.constant 0 : i32
    %c0_i32_0 = arith.constant 0 : i32
    return %arg0, %c0_i32 : i32, i32
  }
  func.func @transform_1(%arg0: i32) -> (i32, i32) {
    %c0_i32 = arith.constant 0 : i32
    %c0_i32_0 = arith.constant 0 : i32
    %c0_i32_1 = arith.constant 0 : i32
    return %c0_i32, %c0_i32_0 : i32, i32
  }
  func.func @transform_2(%arg0: i32) -> (i32, i32) {
    %c0_i32 = arith.constant 0 : i32
    %c0_i32_0 = arith.constant 0 : i32
    %c0_i32_1 = arith.constant 0 : i32
    return %c0_i32, %c0_i32_0 : i32, i32
  }
  func.func @transform_3(%arg0: i32) -> (i32, i32) {
    %c0_i32 = arith.constant 0 : i32
    %c0_i32_0 = arith.constant 0 : i32
    %c0_i32_1 = arith.constant 0 : i32
    return %c0_i32, %c0_i32_0 : i32, i32
  }
  func.func @transform_4(%arg0: i32) -> (i32, i32) {
    %c0_i32 = arith.constant 0 : i32
    %c0_i32_0 = arith.constant 0 : i32
    %c0_i32_1 = arith.constant 0 : i32
    return %c0_i32, %c0_i32_0 : i32, i32
  }
  func.func @transform_5(%arg0: i32) -> (i32, i32) {
    %c0_i32 = arith.constant 0 : i32
    %c0_i32_0 = arith.constant 0 : i32
    %c0_i32_1 = arith.constant 0 : i32
    return %c0_i32, %c0_i32_0 : i32, i32
  }
  func.func @transform_6(%arg0: i32) -> (i32, i32) {
    %c0_i32 = arith.constant 0 : i32
    %c0_i32_0 = arith.constant 0 : i32
    %c0_i32_1 = arith.constant 0 : i32
    return %c0_i32, %c0_i32_0 : i32, i32
  }
  func.func @transform_7(%arg0: i32) -> (i32, i32) {
    %c0_i32 = arith.constant 0 : i32
    %c0_i32_0 = arith.constant 0 : i32
    return %c0_i32, %arg0 : i32, i32
  }
}

</mosaic_0001>

<bundles_post_ra>
// kernel: prediction_model_forward.1
= control target key start
LH: loop header
LB: loop body
LE: loop exit
PB: predicated region body
PF: predicated region fallthrough
CT: control target
= control target key end

     0   :  { %13 = vsyncpa [#allocation4], 0  ;;  %s822_s24 = smov [#allocation3]   ;;  %s1081_s0 = inlined_call_operand.vmem [shape: f32[128,32], index: 0, kind: input, shape index: {}]   ;;  %s1082_s1 = inlined_call_operand.vmem [shape: f32[32,256], index: 1, kind: input, shape index: {}]   ;;  %s1083_s2 = inlined_call_operand.vmem [shape: f32[1,256], index: 2, kind: input, shape index: {}]   ;;  %s1084_s3 = inlined_call_operand.hbm [shape: f32[256,128], index: 3, kind: input, shape index: {}]   ;;  %s1085_s4 = inlined_call_operand.vmem [shape: f32[1,128], index: 4, kind: input, shape index: {}]   ;;  %s1086_s5 = inlined_call_operand.vmem [shape: f32[1,128], index: 5, kind: input, shape index: {}]   ;;  %s1087_s6 = inlined_call_operand.<no memory space> [shape: f32[1,1], index: 6, kind: input, shape index: {}]   ;;  %s1088_s7 = inlined_call_operand.vmem [shape: f32[1,128], index: 7, kind: output, shape index: {}]  }
   0x1   :  { %s25_s25 = sshll.u32 %s822_s24, 4  ;;  %s26_s25 = int_to_ptr.vmem [resolvable:$true] %s25_s25 }
   0x2   :  { %s808_s26 = scalar_lea.vmem %s26_s25, 4096  ;;  %p813_p1 = scmp.lt.s32.totalorder %s26_s25, %s26_s25 }
   0x3   :  { %p809_p0 = scmp.ne.s32.totalorder %s26_s25, %s808_s26  ;;  %p814_p2 = scmp.lt.s32.totalorder %s808_s26, %s808_s26 }
   0x5   :  { %p815_p3 = por %p814_p2, %p813_p1 }
   0x7   :  { %p816_p4 = pnand %p815_p3, %p809_p0 }
   0x9   :  { %819 = shalt.err (!%p816_p4)
}
   0xa   :  { %s823_s27 = smov 128   ;;  %s824_s28 = smov 8  }
   0xb   :  { %31 = dma.hbm_to_vmem [thread:$0]  %s1084_s3, 4096, %s26_s25, [#allocation4], %s823_s27, %s823_s27, %s824_s28  }
   0xc   :  { %820 = dma.done.wait [#allocation4], 4096  }
   0xd   :  { %821 = vsyncadd [#allocation4], 4294963200  ;;  %v825_v0 = vmov 0.0   ;;  %v64_v1 = vld [vmem:[%s1082_s1 + $0x38] sm:$0xff]  ;;  %v63_v2 = vld [vmem:[%s1082_s1 + $0x30] sm:$0xff]  ;;  %vm77_vm0 = vcmask 261120   ;;  %v67_v57 = vlaneseq }
   0xe   :  { %190 = vmatprep.mubr.f32.mxu0 %v825_v0  ;;  %v62_v3 = vld [vmem:[%s1082_s1 + $0x28] sm:$0xff]  ;;  %150 = vmatprep.subr.mxu0 %v64_v1  ;;  %v61_v4 = vld [vmem:[%s1082_s1 + $0x20] sm:$0xff]  ;;  %v60_v5 = vld [vmem:[%s1082_s1 + $0x18] sm:$0xff]  ;;  %vm826_vm1 = vmmov 0  }
   0xf   :  { %151 = vmatpush1.msra.mxu0 %v63_v2  ;;  %v59_v6 = vld [vmem:[%s1082_s1 + $0x10] sm:$0xff]  ;;  %v58_v7 = vld [vmem:[%s1082_s1 + $0x8] sm:$0xff]  ;;  %v57_v8 = vld [vmem:[%s1082_s1] sm:$0xff]  ;;  %v68_v58 = vshrl.u32 %v67_v57, 7 }
  0x10   :  { %152 = vmatprep.subr.mxu0 %v62_v3  ;;  %v41_v9 = vld [vmem:[%s1081_s0] sm:$0xff]  ;;  %v382_v10 = vld [vmem:[#allocation3 + $0xf8] sm:$0xff]  ;;  %v381_v12 = vld [vmem:[#allocation3 + $0xf0] sm:$0xff] }
  0x11   :  { %153 = vmatpush1.msra.mxu0 %v61_v4  ;;  %v366_v11 = vld [vmem:[#allocation3 + $0x78] sm:$0xff]  ;;  %663 = vmatprep.subr.mxu1 %v382_v10  ;;  %v365_v13 = vld [vmem:[#allocation3 + $0x70] sm:$0xff]  ;;  %v42_v14 = vld [vmem:[%s1081_s0 + $0x8] sm:$0xff]  ;;  %v69_v59 = vsub.s32 0, %v68_v58  ;;  %v73_v61 = vsub.s32 1, %v68_v58 }
  0x12   :  { %154 = vmatprep.subr.mxu0 %v60_v5  ;;  %664 = vmatpush3.msra.mxu1 %v366_v11  ;;  %v380_v15 = vld [vmem:[#allocation3 + $0xe8] sm:$0xff]  ;;  %v379_v17 = vld [vmem:[#allocation3 + $0xe0] sm:$0xff]  ;;  %v43_v19 = vld [vmem:[%s1081_s0 + $0x10] sm:$0xff] }
  0x13   :  { %155 = vmatpush1.msra.mxu0 %v59_v6  ;;  %665 = vmatprep.subr.mxu1 %v381_v12  ;;  %v364_v16 = vld [vmem:[#allocation3 + $0x68] sm:$0xff]  ;;  %v363_v18 = vld [vmem:[#allocation3 + $0x60] sm:$0xff]  ;;  %v378_v20 = vld [vmem:[#allocation3 + $0xd8] sm:$0xff] }
  0x14   :  { %156 = vmatprep.subr.mxu0 %v58_v7  ;;  %666 = vmatpush3.msra.mxu1 %v365_v13  ;;  %v362_v21 = vld [vmem:[#allocation3 + $0x58] sm:$0xff]  ;;  %v377_v22 = vld [vmem:[#allocation3 + $0xd0] sm:$0xff]  ;;  %v376_v25 = vld [vmem:[#allocation3 + $0xc8] sm:$0xff] }
  0x15   :  { %157 = vmatpush1.msra.mxu0 %v57_v8  ;;  %667 = vmatprep.subr.mxu1 %v380_v15  ;;  %v361_v23 = vld [vmem:[#allocation3 + $0x50] sm:$0xff]  ;;  %v44_v24 = vld [vmem:[%s1081_s0 + $0x18] sm:$0xff]  ;;  %v360_v26 = vld [vmem:[#allocation3 + $0x48] sm:$0xff] }
  0x16   :  { %646 = vmatmul.mubr.msk.f32.vlgmr.msra.gmra.mxu0 %vm77_vm0, %v41_v9  ;;  %760 = vmatprep.subr.mxu0 %v825_v0  ;;  %v375_v27 = vld [vmem:[#allocation3 + $0xc0] sm:$0xff]  ;;  %v374_v30 = vld [vmem:[#allocation3 + $0xb8] sm:$0xff]  ;;  %v373_v32 = vld [vmem:[#allocation3 + $0xb0] sm:$0xff] }
  0x17   :  { %196 = vmatprep.mubr.f32.mxu0 %v825_v0  ;;  %668 = vmatpush3.msra.mxu1 %v364_v16  ;;  %v359_v28 = vld [vmem:[#allocation3 + $0x40] sm:$0xff]  ;;  %v358_v31 = vld [vmem:[#allocation3 + $0x38] sm:$0xff]  ;;  %v357_v33 = vld [vmem:[#allocation3 + $0x30] sm:$0xff] }
  0x18   :  { %669 = vmatprep.subr.mxu1 %v379_v17  ;;  %v45_v29 = vld [vmem:[%s1081_s0 + $0x20] sm:$0xff]  ;;  %v46_v34 = vld [vmem:[%s1081_s0 + $0x28] sm:$0xff]  ;;  %v47_v37 = vld [vmem:[%s1081_s0 + $0x30] sm:$0xff] }
  0x19   :  { %670 = vmatpush3.msra.mxu1 %v363_v18  ;;  %v372_v35 = vld [vmem:[#allocation3 + $0xa8] sm:$0xff]  ;;  %v48_v38 = vld [vmem:[%s1081_s0 + $0x38] sm:$0xff]  ;;  %v49_v39 = vld [vmem:[%s1081_s0 + $0x40] sm:$0xff] }
  0x1a   :  { %647 = vmatmul.mubr.msk.f32.gmra.mxu0 %vm77_vm0, %v42_v14  ;;  %671 = vmatprep.subr.mxu1 %v378_v20  ;;  %v356_v36 = vld [vmem:[#allocation3 + $0x28] sm:$0xff]  ;;  %v51_v41 = vld [vmem:[%s1081_s0 + $0x50] sm:$0xff]  ;;  %v52_v42 = vld [vmem:[%s1081_s0 + $0x58] sm:$0xff] }
  0x1b   :  { %202 = vmatprep.mubr.f32.mxu0 %v825_v0  ;;  %672 = vmatpush3.msra.mxu1 %v362_v21  ;;  %v50_v40 = vld [vmem:[%s1081_s0 + $0x48] sm:$0xff]  ;;  %v53_v43 = vld [vmem:[%s1081_s0 + $0x60] sm:$0xff]  ;;  %v55_v45 = vld [vmem:[%s1081_s0 + $0x70] sm:$0xff] }
  0x1c   :  { %673 = vmatprep.subr.mxu1 %v377_v22  ;;  %v54_v44 = vld [vmem:[%s1081_s0 + $0x68] sm:$0xff]  ;;  %v56_v46 = vld [vmem:[%s1081_s0 + $0x78] sm:$0xff]  ;;  %v371_v47 = vld [vmem:[#allocation3 + $0xa0] sm:$0xff] }
  0x1d   :  { %674 = vmatpush3.msra.mxu1 %v361_v23  ;;  %v355_v48 = vld [vmem:[#allocation3 + $0x20] sm:$0xff]  ;;  %v370_v49 = vld [vmem:[#allocation3 + $0x98] sm:$0xff]  ;;  %v369_v51 = vld [vmem:[#allocation3 + $0x90] sm:$0xff] }
  0x1e   :  { %648 = vmatmul.mubr.msk.f32.gmra.mxu0 %vm77_vm0, %v43_v19  ;;  %675 = vmatprep.subr.mxu1 %v376_v25  ;;  %v354_v50 = vld [vmem:[#allocation3 + $0x18] sm:$0xff]  ;;  %v353_v52 = vld [vmem:[#allocation3 + $0x10] sm:$0xff]  ;;  %v368_v53 = vld [vmem:[#allocation3 + $0x88] sm:$0xff] }
  0x1f   :  { %208 = vmatprep.mubr.f32.mxu0 %v825_v0  ;;  %676 = vmatpush3.msra.mxu1 %v360_v26  ;;  %v352_v54 = vld [vmem:[#allocation3 + $0x8] sm:$0xff]  ;;  %v367_v55 = vld [vmem:[#allocation3 + $0x80] sm:$0xff] }
  0x20   :  { %677 = vmatprep.subr.mxu1 %v375_v27  ;;  %v351_v56 = vld [vmem:[#allocation3] sm:$0xff] }
  0x21   :  { %678 = vmatpush3.msra.mxu1 %v359_v28  ;;  %v65_v60 = vld [vmem:[%s1083_s2] sm:$0x3] }
  0x22   :  { %649 = vmatmul.mubr.msk.f32.gmra.mxu0 %vm77_vm0, %v44_v24  ;;  %679 = vmatprep.subr.mxu1 %v374_v30  ;;  %v978_v62 = vrot.slane %v65_v60, %v69_v59  ;;  %v980_v63 = vrot.slane %v65_v60, %v73_v61 }
  0x23   :  { %214 = vmatprep.mubr.f32.mxu0 %v825_v0  ;;  %680 = vmatpush3.msra.mxu1 %v358_v31 }
  0x24   :  { %681 = vmatprep.subr.mxu1 %v373_v32 }
  0x25   :  { %682 = vmatpush3.msra.mxu1 %v357_v33 }
  0x26   :  { %650 = vmatmul.mubr.msk.f32.gmra.mxu0 %vm77_vm0, %v45_v29  ;;  %683 = vmatprep.subr.mxu1 %v372_v35 }
  0x27   :  { %220 = vmatprep.mubr.f32.mxu0 %v825_v0  ;;  %684 = vmatpush3.msra.mxu1 %v356_v36 }
  0x28   :  { %685 = vmatprep.subr.mxu1 %v371_v47 }
  0x29   :  { %686 = vmatpush3.msra.mxu1 %v355_v48 }
  0x2a   :  { %651 = vmatmul.mubr.msk.f32.gmra.mxu0 %vm77_vm0, %v46_v34  ;;  %687 = vmatprep.subr.mxu1 %v370_v49 }
  0x2b   :  { %226 = vmatprep.mubr.f32.mxu0 %v825_v0  ;;  %688 = vmatpush3.msra.mxu1 %v354_v50 }
  0x2c   :  { %689 = vmatprep.subr.mxu1 %v369_v51 }
  0x2d   :  { %690 = vmatpush3.msra.mxu1 %v353_v52 }
  0x2e   :  { %652 = vmatmul.mubr.msk.f32.gmra.mxu0 %vm77_vm0, %v47_v37  ;;  %691 = vmatprep.subr.mxu1 %v368_v53 }
  0x2f   :  { %232 = vmatprep.mubr.f32.mxu0 %v825_v0  ;;  %692 = vmatpush3.msra.mxu1 %v352_v54 }
  0x30   :  { %693 = vmatprep.subr.mxu1 %v367_v55 }
  0x31   :  { %694 = vmatpush3.msra.mxu1 %v351_v56 }
  0x32   :  { %653 = vmatmul.mubr.msk.f32.gmra.mxu0 %vm77_vm0, %v48_v38 }
  0x33   :  { %238 = vmatprep.mubr.f32.mxu0 %v825_v0 }
  0x36   :  { %654 = vmatmul.mubr.msk.f32.gmra.mxu0 %vm77_vm0, %v49_v39 }
  0x37   :  { %244 = vmatprep.mubr.f32.mxu0 %v825_v0 }
  0x3a   :  { %655 = vmatmul.mubr.msk.f32.gmra.mxu0 %vm77_vm0, %v50_v40 }
  0x3b   :  { %250 = vmatprep.mubr.f32.mxu0 %v825_v0 }
  0x3e   :  { %656 = vmatmul.mubr.msk.f32.gmra.mxu0 %vm77_vm0, %v51_v41 }
  0x3f   :  { %256 = vmatprep.mubr.f32.mxu0 %v825_v0 }
  0x42   :  { %657 = vmatmul.mubr.msk.f32.gmra.mxu0 %vm77_vm0, %v52_v42 }
  0x43   :  { %262 = vmatprep.mubr.f32.mxu0 %v825_v0 }
  0x46   :  { %658 = vmatmul.mubr.msk.f32.gmra.mxu0 %vm77_vm0, %v53_v43 }
  0x47   :  { %268 = vmatprep.mubr.f32.mxu0 %v825_v0 }
  0x4a   :  { %659 = vmatmul.mubr.msk.f32.gmra.mxu0 %vm77_vm0, %v54_v44 }
  0x4b   :  { %274 = vmatprep.mubr.f32.mxu0 %v825_v0 }
  0x4e   :  { %660 = vmatmul.mubr.msk.f32.gmra.mxu0 %vm77_vm0, %v55_v45 }
  0x4f   :  { %280 = vmatprep.mubr.f32.mxu0 %v825_v0 }
  0x52   :  { %661 = vmatmul.mubr.msk.f32.gmra.mxu0 %vm77_vm0, %v56_v46 }
  0x53   :  { %792 = vmatprep.mubr.msk.f32.mxu0 %vm826_vm1, %v825_v0 }
  0xd6   :  { %v192_v1 = vpop.f32.mrf.mxu0 }
  0xd7   :  { %v193_v2 = vadd.f32 %v192_v1, %v978_v62 }
  0xd8   :  { %v194_v3 = vpop.f32.mrf.mxu0 }
  0xd9   :  { %v195_v4 = vadd.f32 %v194_v3, %v980_v63  ;;  %v287_v5 = vmul.f32 0.01, %v193_v2 }
  0xda   :  { %v198_v6 = vpop.f32.mrf.mxu0 }
  0xdb   :  { %v199_v7 = vadd.f32 %v198_v6, %v978_v62  ;;  %v288_v8 = vmul.f32 0.01, %v195_v4  ;;  %v319_v12 = vmax.f32 %v193_v2, %v287_v5 }
  0xdc   :  { %v200_v9 = vpop.f32.mrf.mxu0 }
  0xdd   :  { %v201_v10 = vadd.f32 %v200_v9, %v980_v63  ;;  %v320_v11 = vmax.f32 %v195_v4, %v288_v8  ;;  %v289_v13 = vmul.f32 0.01, %v199_v7 }
  0xde   :  { %v204_v14 = vpop.f32.mrf.mxu0 }
  0xdf   :  { %v290_v15 = vmul.f32 0.01, %v201_v10  ;;  %v205_v16 = vadd.f32 %v204_v14, %v978_v62  ;;  %454 = vmatprep.mubr.f32.mxu1 %v320_v11  ;;  %v321_v20 = vmax.f32 %v199_v7, %v289_v13 }
  0xe0   :  { %v206_v17 = vpop.f32.mrf.mxu0  ;;  %455 = vmatmul.mubr.f32.vlgmr.msra.gmra.mxu1 %v319_v12 }
  0xe1   :  { %v322_v18 = vmax.f32 %v201_v10, %v290_v15  ;;  %v207_v19 = vadd.f32 %v206_v17, %v980_v63  ;;  %v291_v21 = vmul.f32 0.01, %v205_v16 }
  0xe2   :  { %v210_v22 = vpop.f32.mrf.mxu0 }
  0xe3   :  { %v292_v23 = vmul.f32 0.01, %v207_v19  ;;  %v211_v24 = vadd.f32 %v210_v22, %v978_v62  ;;  %459 = vmatprep.mubr.f32.mxu1 %v322_v18  ;;  %v323_v28 = vmax.f32 %v205_v16, %v291_v21 }
  0xe4   :  { %v212_v25 = vpop.f32.mrf.mxu0  ;;  %460 = vmatmul.mubr.f32.gmra.mxu1 %v321_v20 }
  0xe5   :  { %v324_v26 = vmax.f32 %v207_v19, %v292_v23  ;;  %v213_v27 = vadd.f32 %v212_v25, %v980_v63  ;;  %v293_v29 = vmul.f32 0.01, %v211_v24 }
  0xe6   :  { %v216_v30 = vpop.f32.mrf.mxu0 }
  0xe7   :  { %v294_v31 = vmul.f32 0.01, %v213_v27  ;;  %v217_v32 = vadd.f32 %v216_v30, %v978_v62  ;;  %464 = vmatprep.mubr.f32.mxu1 %v324_v26  ;;  %v325_v36 = vmax.f32 %v211_v24, %v293_v29 }
  0xe8   :  { %v218_v33 = vpop.f32.mrf.mxu0  ;;  %465 = vmatmul.mubr.f32.gmra.mxu1 %v323_v28 }
  0xe9   :  { %v326_v34 = vmax.f32 %v213_v27, %v294_v31  ;;  %v219_v35 = vadd.f32 %v218_v33, %v980_v63  ;;  %v295_v37 = vmul.f32 0.01, %v217_v32 }
  0xea   :  { %v222_v38 = vpop.f32.mrf.mxu0 }
  0xeb   :  { %v296_v39 = vmul.f32 0.01, %v219_v35  ;;  %v223_v40 = vadd.f32 %v222_v38, %v978_v62  ;;  %469 = vmatprep.mubr.f32.mxu1 %v326_v34  ;;  %v327_v44 = vmax.f32 %v217_v32, %v295_v37 }
  0xec   :  { %v224_v41 = vpop.f32.mrf.mxu0  ;;  %470 = vmatmul.mubr.f32.gmra.mxu1 %v325_v36 }
  0xed   :  { %v328_v42 = vmax.f32 %v219_v35, %v296_v39  ;;  %v225_v43 = vadd.f32 %v224_v41, %v980_v63  ;;  %v297_v45 = vmul.f32 0.01, %v223_v40 }
  0xee   :  { %v228_v46 = vpop.f32.mrf.mxu0 }
  0xef   :  { %v298_v47 = vmul.f32 0.01, %v225_v43  ;;  %v229_v48 = vadd.f32 %v228_v46, %v978_v62  ;;  %474 = vmatprep.mubr.f32.mxu1 %v328_v42  ;;  %v329_v52 = vmax.f32 %v223_v40, %v297_v45 }
  0xf0   :  { %v230_v49 = vpop.f32.mrf.mxu0  ;;  %475 = vmatmul.mubr.f32.gmra.mxu1 %v327_v44 }
  0xf1   :  { %v330_v50 = vmax.f32 %v225_v43, %v298_v47  ;;  %v231_v51 = vadd.f32 %v230_v49, %v980_v63  ;;  %v299_v53 = vmul.f32 0.01, %v229_v48 }
  0xf2   :  { %v234_v54 = vpop.f32.mrf.mxu0 }
  0xf3   :  { %v300_v55 = vmul.f32 0.01, %v231_v51  ;;  %v235_v56 = vadd.f32 %v234_v54, %v978_v62  ;;  %479 = vmatprep.mubr.f32.mxu1 %v330_v50  ;;  %v331_v60 = vmax.f32 %v229_v48, %v299_v53 }
  0xf4   :  { %v236_v57 = vpop.f32.mrf.mxu0  ;;  %480 = vmatmul.mubr.f32.gmra.mxu1 %v329_v52 }
  0xf5   :  { %v332_v58 = vmax.f32 %v231_v51, %v300_v55  ;;  %v237_v59 = vadd.f32 %v236_v57, %v980_v63  ;;  %v301_v61 = vmul.f32 0.01, %v235_v56 }
  0xf6   :  { %v240_v1 = vpop.f32.mrf.mxu0 }
  0xf7   :  { %v302_v2 = vmul.f32 0.01, %v237_v59  ;;  %v241_v3 = vadd.f32 %v240_v1, %v978_v62  ;;  %484 = vmatprep.mubr.f32.mxu1 %v332_v58  ;;  %v333_v7 = vmax.f32 %v235_v56, %v301_v61 }
  0xf8   :  { %v242_v4 = vpop.f32.mrf.mxu0  ;;  %485 = vmatmul.mubr.f32.gmra.mxu1 %v331_v60 }
  0xf9   :  { %v334_v5 = vmax.f32 %v237_v59, %v302_v2  ;;  %v243_v6 = vadd.f32 %v242_v4, %v980_v63  ;;  %v303_v8 = vmul.f32 0.01, %v241_v3 }
  0xfa   :  { %v246_v9 = vpop.f32.mrf.mxu0 }
  0xfb   :  { %v304_v10 = vmul.f32 0.01, %v243_v6  ;;  %v247_v11 = vadd.f32 %v246_v9, %v978_v62  ;;  %489 = vmatprep.mubr.f32.mxu1 %v334_v5  ;;  %v335_v15 = vmax.f32 %v241_v3, %v303_v8 }
  0xfc   :  { %v248_v12 = vpop.f32.mrf.mxu0  ;;  %490 = vmatmul.mubr.f32.gmra.mxu1 %v333_v7 }
  0xfd   :  { %v336_v13 = vmax.f32 %v243_v6, %v304_v10  ;;  %v249_v14 = vadd.f32 %v248_v12, %v980_v63  ;;  %v305_v16 = vmul.f32 0.01, %v247_v11 }
  0xfe   :  { %v252_v17 = vpop.f32.mrf.mxu0 }
  0xff   :  { %v306_v18 = vmul.f32 0.01, %v249_v14  ;;  %v253_v19 = vadd.f32 %v252_v17, %v978_v62  ;;  %494 = vmatprep.mubr.f32.mxu1 %v336_v13  ;;  %v337_v23 = vmax.f32 %v247_v11, %v305_v16 }
 0x100   :  { %v254_v20 = vpop.f32.mrf.mxu0  ;;  %495 = vmatmul.mubr.f32.gmra.mxu1 %v335_v15 }
 0x101   :  { %v338_v21 = vmax.f32 %v249_v14, %v306_v18  ;;  %v255_v22 = vadd.f32 %v254_v20, %v980_v63  ;;  %v307_v24 = vmul.f32 0.01, %v253_v19 }
 0x102   :  { %v258_v25 = vpop.f32.mrf.mxu0 }
 0x103   :  { %v308_v26 = vmul.f32 0.01, %v255_v22  ;;  %v259_v27 = vadd.f32 %v258_v25, %v978_v62  ;;  %499 = vmatprep.mubr.f32.mxu1 %v338_v21  ;;  %v339_v31 = vmax.f32 %v253_v19, %v307_v24 }
 0x104   :  { %v260_v28 = vpop.f32.mrf.mxu0  ;;  %500 = vmatmul.mubr.f32.gmra.mxu1 %v337_v23 }
 0x105   :  { %v340_v29 = vmax.f32 %v255_v22, %v308_v26  ;;  %v261_v30 = vadd.f32 %v260_v28, %v980_v63  ;;  %v309_v32 = vmul.f32 0.01, %v259_v27 }
 0x106   :  { %v264_v33 = vpop.f32.mrf.mxu0 }
 0x107   :  { %v310_v34 = vmul.f32 0.01, %v261_v30  ;;  %v265_v35 = vadd.f32 %v264_v33, %v978_v62  ;;  %504 = vmatprep.mubr.f32.mxu1 %v340_v29  ;;  %v341_v39 = vmax.f32 %v259_v27, %v309_v32 }
 0x108   :  { %v266_v36 = vpop.f32.mrf.mxu0  ;;  %505 = vmatmul.mubr.f32.gmra.mxu1 %v339_v31 }
 0x109   :  { %v342_v37 = vmax.f32 %v261_v30, %v310_v34  ;;  %v267_v38 = vadd.f32 %v266_v36, %v980_v63  ;;  %v311_v40 = vmul.f32 0.01, %v265_v35 }
 0x10a   :  { %v270_v41 = vpop.f32.mrf.mxu0 }
 0x10b   :  { %v312_v42 = vmul.f32 0.01, %v267_v38  ;;  %v271_v43 = vadd.f32 %v270_v41, %v978_v62  ;;  %509 = vmatprep.mubr.f32.mxu1 %v342_v37  ;;  %v343_v47 = vmax.f32 %v265_v35, %v311_v40 }
 0x10c   :  { %v272_v44 = vpop.f32.mrf.mxu0  ;;  %510 = vmatmul.mubr.f32.gmra.mxu1 %v341_v39 }
 0x10d   :  { %v344_v45 = vmax.f32 %v267_v38, %v312_v42  ;;  %v273_v46 = vadd.f32 %v272_v44, %v980_v63  ;;  %v313_v48 = vmul.f32 0.01, %v271_v43 }
 0x10e   :  { %v276_v49 = vpop.f32.mrf.mxu0 }
 0x10f   :  { %v314_v50 = vmul.f32 0.01, %v273_v46  ;;  %v277_v51 = vadd.f32 %v276_v49, %v978_v62  ;;  %514 = vmatprep.mubr.f32.mxu1 %v344_v45  ;;  %v345_v55 = vmax.f32 %v271_v43, %v313_v48 }
 0x110   :  { %v278_v52 = vpop.f32.mrf.mxu0  ;;  %515 = vmatmul.mubr.f32.gmra.mxu1 %v343_v47  ;;  %v1032_v47 = vld [vmem:[%s1085_s4] ss:$0 sm:$0xff] }
 0x111   :  { %v346_v53 = vmax.f32 %v273_v46, %v314_v50  ;;  %v279_v54 = vadd.f32 %v278_v52, %v980_v63  ;;  %v315_v56 = vmul.f32 0.01, %v277_v51 }
 0x112   :  { %v282_v57 = vpop.f32.mrf.mxu0 }
 0x113   :  { %v316_v58 = vmul.f32 0.01, %v279_v54  ;;  %v283_v59 = vadd.f32 %v282_v57, %v978_v62  ;;  %519 = vmatprep.mubr.f32.mxu1 %v346_v53  ;;  %v347_v2 = vmax.f32 %v277_v51, %v315_v56 }
 0x114   :  { %v284_v60 = vpop.f32.mrf.mxu0  ;;  %520 = vmatmul.mubr.f32.gmra.mxu1 %v345_v55 }
 0x115   :  { %v348_v61 = vmax.f32 %v279_v54, %v316_v58  ;;  %v285_v1 = vadd.f32 %v284_v60, %v980_v63  ;;  %v317_v3 = vmul.f32 0.01, %v283_v59 }
 0x117   :  { %v318_v4 = vmul.f32 0.01, %v285_v1  ;;  %524 = vmatprep.mubr.f32.mxu1 %v348_v61  ;;  %v349_v6 = vmax.f32 %v283_v59, %v317_v3 }
 0x118   :  { %525 = vmatmul.mubr.f32.gmra.mxu1 %v347_v2 }
 0x119   :  { %v350_v5 = vmax.f32 %v285_v1, %v318_v4 }
 0x11b   :  { %529 = vmatprep.mubr.f32.mxu1 %v350_v5 }
 0x11c   :  { %530 = vmatmul.mubr.f32.gmra.mxu1 %v349_v6 }
 0x1a0   :  { %v695_v7 = vpop.f32.mrf.mxu1 }
 0x1a2   :  { %v696_v8 = vpop.f32.mrf.mxu1 }
 0x1a3   :  { %v1014_v9 = vadd.f32 %v696_v8, %v695_v7 }
 0x1a4   :  { %v698_v62 = vpop.f32.mrf.mxu1 }
 0x1a6   :  { %v699_v10 = vpop.f32.mrf.mxu1 }
 0x1a7   :  { %v1017_v11 = vadd.f32 %v699_v10, %v698_v62 }
 0x1a8   :  { %v701_v63 = vpop.f32.mrf.mxu1 }
 0x1aa   :  { %v702_v12 = vpop.f32.mrf.mxu1 }
 0x1ab   :  { %v1019_v13 = vadd.f32 %v702_v12, %v701_v63 }
 0x1ac   :  { %v704_v14 = vpop.f32.mrf.mxu1 }
 0x1ae   :  { %v705_v15 = vpop.f32.mrf.mxu1 }
 0x1af   :  { %v1021_v16 = vadd.f32 %v705_v15, %v704_v14 }
 0x1b0   :  { %v707_v17 = vpop.f32.mrf.mxu1 }
 0x1b2   :  { %v708_v18 = vpop.f32.mrf.mxu1 }
 0x1b3   :  { %v1023_v19 = vadd.f32 %v708_v18, %v707_v17 }
 0x1b4   :  { %v710_v20 = vpop.f32.mrf.mxu1 }
 0x1b6   :  { %v711_v21 = vpop.f32.mrf.mxu1 }
 0x1b7   :  { %v1025_v22 = vadd.f32 %v711_v21, %v710_v20 }
 0x1b8   :  { %v713_v23 = vpop.f32.mrf.mxu1 }
 0x1ba   :  { %v714_v24 = vpop.f32.mrf.mxu1 }
 0x1bb   :  { %v1027_v25 = vadd.f32 %v714_v24, %v713_v23  ;;  %v482_v24 = vadd.f32 %v1025_v22, %v1032_v47  ;;  %v467_v22 = vadd.f32 %v1019_v13, %v1032_v47 }
 0x1bc   :  { %v716_v26 = vpop.f32.mrf.mxu1 }
 0x1bd   :  { %v487_v20 = vadd.f32 %v1027_v25, %v1032_v47  ;;  %v472_v25 = vadd.f32 %v1021_v16, %v1032_v47  ;;  %v457_v16 = vadd.f32 %v1014_v9, %v1032_v47  ;;  %v569_v9 = vstv %s1087_s6 }
 0x1be   :  { %v717_v27 = vpop.f32.mrf.mxu1 }
 0x1bf   :  { %v718_v28 = vadd.f32 %v717_v27, %v716_v26  ;;  %v541_v26 = vmul.f32 0.01, %v487_v20  ;;  %v535_v13 = vmul.f32 0.01, %v457_v16 }
 0x1c0   :  { %v719_v29 = vpop.f32.mrf.mxu1 }
 0x1c1   :  { %v492_v15 = vadd.f32 %v718_v28, %v1032_v47  ;;  %v477_v28 = vadd.f32 %v1023_v19, %v1032_v47  ;;  %v462_v19 = vadd.f32 %v1017_v11, %v1032_v47  ;;  %v567_v11 = vld [vmem:[%s1086_s5] sm:$0x1] }
 0x1c2   :  { %v720_v30 = vpop.f32.mrf.mxu1 }
 0x1c3   :  { %v721_v7 = vadd.f32 %v720_v30, %v719_v29  ;;  %v542_v21 = vmul.f32 0.01, %v492_v15  ;;  %v540_v29 = vmul.f32 0.01, %v482_v24  ;;  %v557_v30 = vmax.f32 %v487_v20, %v541_v26 }
 0x1c4   :  { %v722_v31 = vpop.f32.mrf.mxu1 }
 0x1c5   :  { %v497_v63 = vadd.f32 %v721_v7, %v1032_v47  ;;  %v558_v27 = vmax.f32 %v492_v15, %v542_v21 }
 0x1c6   :  { %v723_v32 = vpop.f32.mrf.mxu1 }
 0x1c7   :  { %v724_v3 = vadd.f32 %v723_v32, %v722_v31  ;;  %v543_v17 = vmul.f32 0.01, %v497_v63  ;;  %v539_v31 = vmul.f32 0.01, %v477_v28  ;;  %v556_v32 = vmax.f32 %v482_v24, %v540_v29 }
 0x1c8   :  { %v725_v33 = vpop.f32.mrf.mxu1 }
 0x1c9   :  { %v502_v8 = vadd.f32 %v724_v3, %v1032_v47  ;;  %v559_v23 = vmax.f32 %v497_v63, %v543_v17 }
 0x1ca   :  { %v726_v34 = vpop.f32.mrf.mxu1 }
 0x1cb   :  { %v727_v60 = vadd.f32 %v726_v34, %v725_v33  ;;  %v544_v12 = vmul.f32 0.01, %v502_v8  ;;  %v538_v33 = vmul.f32 0.01, %v472_v25  ;;  %v555_v34 = vmax.f32 %v477_v28, %v539_v31 }
 0x1cc   :  { %v728_v35 = vpop.f32.mrf.mxu1 }
 0x1cd   :  { %v507_v4 = vadd.f32 %v727_v60, %v1032_v47  ;;  %v560_v18 = vmax.f32 %v502_v8, %v544_v12 }
 0x1ce   :  { %v729_v36 = vpop.f32.mrf.mxu1 }
 0x1cf   :  { %v730_v56 = vadd.f32 %v729_v36, %v728_v35  ;;  %v545_v62 = vmul.f32 0.01, %v507_v4  ;;  %v537_v35 = vmul.f32 0.01, %v467_v22  ;;  %v554_v36 = vmax.f32 %v472_v25, %v538_v33 }
 0x1d0   :  { %v731_v37 = vpop.f32.mrf.mxu1 }
 0x1d1   :  { %v512_v61 = vadd.f32 %v730_v56, %v1032_v47  ;;  %v561_v14 = vmax.f32 %v507_v4, %v545_v62 }
 0x1d2   :  { %v732_v38 = vpop.f32.mrf.mxu1 }
 0x1d3   :  { %v733_v52 = vadd.f32 %v732_v38, %v731_v37  ;;  %v546_v5 = vmul.f32 0.01, %v512_v61  ;;  %v536_v37 = vmul.f32 0.01, %v462_v19  ;;  %v553_v38 = vmax.f32 %v467_v22, %v537_v35 }
 0x1d4   :  { %v734_v39 = vpop.f32.mrf.mxu1 }
 0x1d5   :  { %v517_v57 = vadd.f32 %v733_v52, %v1032_v47  ;;  %v562_v10 = vmax.f32 %v512_v61, %v546_v5 }
 0x1d6   :  { %v735_v40 = vpop.f32.mrf.mxu1 }
 0x1d7   :  { %v736_v48 = vadd.f32 %v735_v40, %v734_v39  ;;  %v547_v1 = vmul.f32 0.01, %v517_v57  ;;  %v552_v39 = vmax.f32 %v462_v19, %v536_v37  ;;  %v551_v40 = vmax.f32 %v457_v16, %v535_v13 }
 0x1d8   :  { %v737_v41 = vpop.f32.mrf.mxu1 }
 0x1d9   :  { %v522_v53 = vadd.f32 %v736_v48, %v1032_v47  ;;  %v563_v6 = vmax.f32 %v517_v57, %v547_v1 }
 0x1da   :  { %v738_v42 = vpop.f32.mrf.mxu1 }
 0x1db   :  { %v739_v44 = vadd.f32 %v738_v42, %v737_v41  ;;  %v548_v58 = vmul.f32 0.01, %v522_v53 }
 0x1dc   :  { %v740_v43 = vpop.f32.mrf.mxu1 }
 0x1dd   :  { %v527_v49 = vadd.f32 %v739_v44, %v1032_v47  ;;  %v564_v2 = vmax.f32 %v522_v53, %v548_v58 }
 0x1de   :  { %v741_v45 = vpop.f32.mrf.mxu1 }
 0x1df   :  { %v742_v46 = vadd.f32 %v741_v45, %v740_v43  ;;  %v549_v54 = vmul.f32 0.01, %v527_v49 }
 0x1e1   :  { %v532_v50 = vadd.f32 %v742_v46, %v1032_v47  ;;  %v565_v59 = vmax.f32 %v527_v49, %v549_v54 }
 0x1e3   :  { %v550_v51 = vmul.f32 0.01, %v532_v50 }
 0x1e5   :  { %v566_v55 = vmax.f32 %v532_v50, %v550_v51 }
 0x1e7   :  { %761 = vmatpush3.xpose.msra.mxu0 %v566_v55 }
 0x1e8   :  { %762 = vmatprep.subr.mxu0 %v825_v0 }
 0x1eb   :  { %763 = vmatpush3.xpose.msra.mxu0 %v565_v59 }
 0x1ec   :  { %764 = vmatprep.subr.mxu0 %v825_v0 }
 0x1ef   :  { %765 = vmatpush3.xpose.msra.mxu0 %v564_v2 }
 0x1f0   :  { %766 = vmatprep.subr.mxu0 %v825_v0 }
 0x1f3   :  { %767 = vmatpush3.xpose.msra.mxu0 %v563_v6 }
 0x1f4   :  { %768 = vmatprep.subr.mxu0 %v825_v0 }
 0x1f7   :  { %769 = vmatpush3.xpose.msra.mxu0 %v562_v10 }
 0x1f8   :  { %770 = vmatprep.subr.mxu0 %v825_v0 }
 0x1fb   :  { %771 = vmatpush3.xpose.msra.mxu0 %v561_v14 }
 0x1fc   :  { %772 = vmatprep.subr.mxu0 %v825_v0 }
 0x1ff   :  { %773 = vmatpush3.xpose.msra.mxu0 %v560_v18 }
 0x200   :  { %774 = vmatprep.subr.mxu0 %v825_v0 }
 0x203   :  { %775 = vmatpush3.xpose.msra.mxu0 %v559_v23 }
 0x204   :  { %776 = vmatprep.subr.mxu0 %v825_v0 }
 0x207   :  { %777 = vmatpush3.xpose.msra.mxu0 %v558_v27 }
 0x208   :  { %778 = vmatprep.subr.mxu0 %v825_v0 }
 0x20b   :  { %779 = vmatpush3.xpose.msra.mxu0 %v557_v30 }
 0x20c   :  { %780 = vmatprep.subr.mxu0 %v825_v0 }
 0x20f   :  { %781 = vmatpush3.xpose.msra.mxu0 %v556_v32 }
 0x210   :  { %782 = vmatprep.subr.mxu0 %v825_v0 }
 0x213   :  { %783 = vmatpush3.xpose.msra.mxu0 %v555_v34 }
 0x214   :  { %784 = vmatprep.subr.mxu0 %v825_v0 }
 0x217   :  { %785 = vmatpush3.xpose.msra.mxu0 %v554_v36 }
 0x218   :  { %786 = vmatprep.subr.mxu0 %v825_v0 }
 0x21b   :  { %787 = vmatpush3.xpose.msra.mxu0 %v553_v38 }
 0x21c   :  { %788 = vmatprep.subr.mxu0 %v825_v0 }
 0x21f   :  { %789 = vmatpush3.xpose.msra.mxu0 %v552_v39 }
 0x220   :  { %790 = vmatprep.subr.mxu0 %v825_v0 }
 0x223   :  { %791 = vmatpush3.xpose.msra.mxu0 %v551_v40 }
 0x226   :  { %793 = vmatmul.mubr.f32.vlgmr.msra.gmra.mxu0 %v567_v11 }
 0x2e6   :  { %v636_v41 = vpop.f32.mrf.mxu0 }
 0x2e7   :  { %v637_v42 = vadd.f32 %v636_v41, %v569_v9 }
 0x2e8   :  { %v794_v43 = vpop.f32.mrf.mxu0 }
 0x2e9   :  { %640 = vst [vmem:[%s1088_s7] sm:$0x1] %v637_v42 }
 0x2ea   :  { %645 = vsyncpa [#allocation4], 1 }

</bundles_post_ra>
